<compile_context>
chip_gen: v7x
topology: tpu7x:2x2x1
jax: 0.10.0
libtpu: 0.0.40
codegen_flags: <defaults>
</compile_context>

<pallas_src>
import functools

import jax
import jax.numpy as jnp
from jax.experimental import pallas as pl
from jax.experimental.pallas import tpu as pltpu


def _layer_norm(x, gamma, beta, eps):
    # x: (S, D), gamma/beta: (1, D). PyTorch LayerNorm uses biased variance.
    mean = jnp.mean(x, axis=-1, keepdims=True)
    var = jnp.mean((x - mean) ** 2, axis=-1, keepdims=True)
    inv = jax.lax.rsqrt(var + eps)
    return (x - mean) * inv * gamma + beta


def encoder_block_kernel(x_ref, mask_ref,
                         wqkv_ref, bqkv_ref, wo_ref, w1_ref, w2_ref,
                         vecs_ref,
                         out_ref,
                         *, num_heads, d_k, eps):
    x = x_ref[0]                      # (S, D) float32
    S = x.shape[0]
    d_model = num_heads * d_k
    cdt = wqkv_ref.dtype              # matmul operand dtype (f32 or bf16)

    # ---- Fused QKV projection: one MXU pass with N = 3D ------------------
    xc = x.astype(cdt)
    qkv = jnp.dot(xc, wqkv_ref[...],
                  preferred_element_type=jnp.float32) + bqkv_ref[...]   # (S, 3D) f32
    q = qkv[:, :d_model]
    k = qkv[:, d_model:2 * d_model]
    v = qkv[:, 2 * d_model:]

    # ---- Boolean attend-mask, computed once (hoisted out of the head loop)
    attend = mask_ref[0] != 0                                 # (S, S) bool
    neg_inf = jnp.float32(-1e9)

    # ---- Per-head attention, accumulated straight into the Wo projection -
    wo = wo_ref[...]                                          # (D, D) in cdt
    scale = 1.0 / (d_k ** 0.5)
    acc = jnp.zeros((S, d_model), jnp.float32)
    for h in range(num_heads):        # static unroll, num_heads is small
        sl = slice(h * d_k, (h + 1) * d_k)
        qh = q[:, sl].astype(cdt)                             # (S, dk)
        kh = k[:, sl].astype(cdt)                             # (S, dk)
        vh = v[:, sl].astype(cdt)                             # (S, dk)
        # contract over the last dim of both operands (no explicit transpose)
        scores = jax.lax.dot_general(
            qh, kh, (((1,), (1,)), ((), ())),
            preferred_element_type=jnp.float32) * scale                   # (S, S)
        scores = jnp.where(attend, scores, neg_inf)
        # numerically-stable softmax; exact division (approx reciprocal was the
        # source of the previous accuracy failure).
        scores = scores - jnp.max(scores, axis=-1, keepdims=True)
        p = jnp.exp(scores)
        p = p / jnp.sum(p, axis=-1, keepdims=True)
        oh = jnp.dot(p.astype(cdt), vh,
                     preferred_element_type=jnp.float32)                  # (S, dk)
        # accumulate this head's contribution to the output projection
        acc = acc + jnp.dot(oh.astype(cdt), wo[sl, :],
                            preferred_element_type=jnp.float32)           # (S, D)

    # ---- Packed bias / LayerNorm parameters -------------------------------
    vecs = vecs_ref[...]              # (8, D) f32
    bo, b1, b2 = vecs[0:1, :], vecs[1:2, :], vecs[2:3, :]
    g1, be1 = vecs[3:4, :], vecs[4:5, :]
    g2, be2 = vecs[5:6, :], vecs[6:7, :]

    attn = acc + bo

    # ---- residual + LayerNorm 1 -------------------------------------------
    h1 = _layer_norm(attn + x, g1, be1, eps)

    # ---- FeedForward -------------------------------------------------------
    ff = jnp.dot(h1.astype(cdt), w1_ref[...],
                 preferred_element_type=jnp.float32) + b1
    ff = jnp.maximum(ff, 0.0)
    ff = jnp.dot(ff.astype(cdt), w2_ref[...],
                 preferred_element_type=jnp.float32) + b2

    # ---- residual + LayerNorm 2 -------------------------------------------
    out_ref[0] = _layer_norm(h1 + ff, g2, be2, eps)


def encoder_block(x, mask, params, *, num_heads, eps,
                  compute_dtype=jnp.float32):
    """compute_dtype: dtype used for MXU matmul operands (f32 or bf16).
    Accumulation is always f32; softmax / LayerNorm math is always f32."""
    B, S, D = x.shape
    d_k = D // num_heads

    # Pack parameters in the wrapper (traced once under jit; cheap XLA concats).
    wqkv = jnp.concatenate([params["wq"], params["wk"], params["wv"]],
                           axis=1).astype(compute_dtype)                 # (D, 3D)
    bqkv = jnp.concatenate([params["bq"], params["bk"], params["bv"]],
                           axis=1).astype(jnp.float32)                   # (1, 3D)
    wo = params["wo"].astype(compute_dtype)
    w1 = params["w1"].astype(compute_dtype)
    w2 = params["w2"].astype(compute_dtype)
    # 7 small (1, D) vectors packed into one (8, D) array (one DMA, not seven).
    vecs = jnp.concatenate(
        [params["bo"], params["b1"], params["b2"],
         params["g1"], params["be1"], params["g2"], params["be2"],
         jnp.zeros((1, D), jnp.float32)], axis=0)                        # (8, D)

    # int8 mask: 4x less HBM traffic / VMEM residency than float32.
    mask_i8 = (mask > 0).astype(jnp.int8)

    kernel = functools.partial(encoder_block_kernel,
                               num_heads=num_heads, d_k=d_k, eps=eps)

    # Per-batch tiles for activations; weights fully resident (constant index_map).
    x_spec = pl.BlockSpec((1, S, D), lambda b: (b, 0, 0))
    m_spec = pl.BlockSpec((1, S, S), lambda b: (b, 0, 0))

    in_specs = [
        x_spec, m_spec,
        pl.BlockSpec((D, 3 * D), lambda b: (0, 0)),   # Wqkv
        pl.BlockSpec((1, 3 * D), lambda b: (0, 0)),   # bqkv
        pl.BlockSpec((D, D), lambda b: (0, 0)),       # Wo
        pl.BlockSpec((D, D), lambda b: (0, 0)),       # W1
        pl.BlockSpec((D, D), lambda b: (0, 0)),       # W2
        pl.BlockSpec((8, D), lambda b: (0, 0)),       # packed bias / LN params
    ]

    return pl.pallas_call(
        kernel,
        out_shape=jax.ShapeDtypeStruct((B, S, D), jnp.float32),
        grid_spec=pltpu.PrefetchScalarGridSpec(
            num_scalar_prefetch=0,
            grid=(B,),
            in_specs=in_specs,
            out_specs=pl.BlockSpec((1, S, D), lambda b: (b, 0, 0)),
        ),
        compiler_params=pltpu.CompilerParams(
            dimension_semantics=("parallel",),
            vmem_limit_bytes=48 * 1024 * 1024,
        ),
    )(x, mask_i8, wqkv, bqkv, wo, w1, w2, vecs)


def encoder_block_ref(x, mask, params, *, num_heads, eps):
    """Pure-JAX reference (mirrors the PyTorch forward)."""
    B, S, D = x.shape
    d_k = D // num_heads

    def ln(z, g, b):
        m = jnp.mean(z, axis=-1, keepdims=True)
        v = jnp.mean((z - m) ** 2, axis=-1, keepdims=True)
        return (z - m) / jnp.sqrt(v + eps) * g + b

    q = x @ params["wq"] + params["bq"]
    k = x @ params["wk"] + params["bk"]
    v = x @ params["wv"] + params["bv"]
    q = q.reshape(B, S, num_heads, d_k).transpose(0, 2, 1, 3)
    k = k.reshape(B, S, num_heads, d_k).transpose(0, 2, 1, 3)
    v = v.reshape(B, S, num_heads, d_k).transpose(0, 2, 1, 3)
    scores = jnp.einsum("bhqd,bhkd->bhqk", q, k) / (d_k ** 0.5)
    scores = jnp.where(mask[:, None, :, :] > 0.0, scores, -1e9)
    p = jax.nn.softmax(scores, axis=-1)
    attn = jnp.einsum("bhqk,bhkd->bhqd", p, v).transpose(0, 2, 1, 3).reshape(B, S, D)
    attn = attn @ params["wo"] + params["bo"]
    h1 = ln(attn + x, params["g1"], params["be1"])
    ff = jnp.maximum(h1 @ params["w1"] + params["b1"], 0.0) @ params["w2"] + params["b2"]
    return ln(h1 + ff, params["g2"], params["be2"])


def init_params(key, d_model):
    names = ["wq", "wk", "wv", "wo", "w1", "w2"]
    keys = jax.random.split(key, len(names))
    params = {}
    scale = 1.0 / (d_model ** 0.5)
    for n, k in zip(names, keys):
        params[n] = jax.random.normal(k, (d_model, d_model), jnp.float32) * scale
    for n in ["bq", "bk", "bv", "bo", "b1", "b2", "be1", "be2"]:
        params[n] = jnp.zeros((1, d_model), jnp.float32)
    params["g1"] = jnp.ones((1, d_model), jnp.float32)
    params["g2"] = jnp.ones((1, d_model), jnp.float32)
    # Small non-trivial biases / LN params so the test is not degenerate.
    params["bq"] = params["bq"] + 0.01
    params["b1"] = params["b1"] + 0.02
    params["be1"] = params["be1"] + 0.03
    params["g2"] = params["g2"] * 1.1
    return params


if __name__ == "__main__":
    B, S, D, H = 2, 8, 32, 4
    EPS = 1e-5

    key = jax.random.PRNGKey(0)
    kx, km, kp = jax.random.split(key, 3)

    x = jax.random.normal(kx, (B, S, D), jnp.float32)
    # Binary attention mask (1 = attend). Keep the diagonal so no row is fully masked.
    mask = (jax.random.uniform(km, (B, S, S)) > 0.3).astype(jnp.float32)
    mask = jnp.maximum(mask, jnp.eye(S, dtype=jnp.float32)[None])

    params = init_params(kp, D)

    ref = encoder_block_ref(x, mask, params, num_heads=H, eps=EPS)

    # f32 matmul operands: exact softmax / exact math -> tight check.
    out_f32 = encoder_block(x, mask, params, num_heads=H, eps=EPS,
                            compute_dtype=jnp.float32)
    out_f32 = jax.block_until_ready(out_f32)
    assert out_f32.shape == (B, S, D)
    assert jnp.allclose(out_f32, ref, atol=2e-3, rtol=2e-3), (
        "f32 mismatch vs reference: max abs err = "
        f"{float(jnp.max(jnp.abs(out_f32 - ref)))}")

    # bf16 matmul operands, f32 accumulation (fast path; loose sanity check only).
    out_bf16 = encoder_block(x, mask, params, num_heads=H, eps=EPS,
                             compute_dtype=jnp.bfloat16)
    out_bf16 = jax.block_until_ready(out_bf16)
    assert out_bf16.shape == (B, S, D)
    assert bool(jnp.all(jnp.isfinite(out_bf16)))
    err_bf16 = float(jnp.max(jnp.abs(out_bf16 - ref)))
    assert err_bf16 < 0.3, f"bf16 deviation too large: {err_bf16}"

    print("KERNEL_OK")
</pallas_src>

<mosaic_0001>
module attributes {stable_mosaic.version = 11 : i64} {
  func.func @encoder_block_kernel(%arg0: i32, %arg1: memref<1x8x32xf32, #tpu.memory_space<vmem>>, %arg2: memref<1x8x8xi8, #tpu.memory_space<vmem>>, %arg3: memref<32x96xf32, #tpu.memory_space<vmem>>, %arg4: memref<1x96xf32, #tpu.memory_space<vmem>>, %arg5: memref<32x32xf32, #tpu.memory_space<vmem>>, %arg6: memref<32x32xf32, #tpu.memory_space<vmem>>, %arg7: memref<32x32xf32, #tpu.memory_space<vmem>>, %arg8: memref<8x32xf32, #tpu.memory_space<vmem>>, %arg9: memref<1x8x32xf32, #tpu.memory_space<vmem>>) attributes {dimension_semantics = [#tpu.dimension_semantics<parallel>], iteration_bounds = array<i64: 2>, scalar_prefetch = 0 : i64, scratch_operands = 0 : i64, tpu.core_type = #tpu.core_type<tc>, window_params = [{transform_indices = @transform_0, window_bounds = array<i64: 1, 8, 32>}, {transform_indices = @transform_1, window_bounds = array<i64: 1, 8, 8>}, {pipeline_mode = #tpu.pipeline_mode<synchronous>, transform_indices = @transform_2, window_bounds = array<i64: 32, 96>}, {pipeline_mode = #tpu.pipeline_mode<synchronous>, transform_indices = @transform_3, window_bounds = array<i64: 1, 96>}, {pipeline_mode = #tpu.pipeline_mode<synchronous>, transform_indices = @transform_4, window_bounds = array<i64: 32, 32>}, {pipeline_mode = #tpu.pipeline_mode<synchronous>, transform_indices = @transform_5, window_bounds = array<i64: 32, 32>}, {pipeline_mode = #tpu.pipeline_mode<synchronous>, transform_indices = @transform_6, window_bounds = array<i64: 32, 32>}, {pipeline_mode = #tpu.pipeline_mode<synchronous>, transform_indices = @transform_7, window_bounds = array<i64: 8, 32>}, {transform_indices = @transform_8, window_bounds = array<i64: 1, 8, 32>}]} {
    %c0 = arith.constant 0 : index
    %c0_0 = arith.constant 0 : index
    %c0_1 = arith.constant 0 : index
    %0 = vector.load %arg1[%c0, %c0_0, %c0_1] : memref<1x8x32xf32, #tpu.memory_space<vmem>>, vector<1x8x32xf32>
    %1 = vector.shape_cast %0 : vector<1x8x32xf32> to vector<8x32xf32>
    %c0_2 = arith.constant 0 : index
    %c0_3 = arith.constant 0 : index
    %2 = vector.load %arg3[%c0_2, %c0_3] : memref<32x96xf32, #tpu.memory_space<vmem>>, vector<32x96xf32>
    %cst = arith.constant dense<0.000000e+00> : vector<8x96xf32>
    %3 = tpu.matmul %1, %2, %cst {dimension_numbers = #tpu.dot_dimension_numbers<[1], [0], [0], [1], [0, 0, 1, 1], [], []>} : vector<8x32xf32>, vector<32x96xf32>, vector<8x96xf32> -> vector<8x96xf32>
    %c0_4 = arith.constant 0 : index
    %c0_5 = arith.constant 0 : index
    %4 = vector.load %arg4[%c0_4, %c0_5] : memref<1x96xf32, #tpu.memory_space<vmem>>, vector<1x96xf32>
    %5 = vector.broadcast %4 : vector<1x96xf32> to vector<8x96xf32>
    %6 = arith.addf %3, %5 : vector<8x96xf32>
    %7 = vector.extract_strided_slice %6 {offsets = [0, 0], sizes = [8, 32], strides = [1, 1]} : vector<8x96xf32> to vector<8x32xf32>
    %8 = vector.extract_strided_slice %6 {offsets = [0, 32], sizes = [8, 32], strides = [1, 1]} : vector<8x96xf32> to vector<8x32xf32>
    %9 = vector.extract_strided_slice %6 {offsets = [0, 64], sizes = [8, 32], strides = [1, 1]} : vector<8x96xf32> to vector<8x32xf32>
    %c0_6 = arith.constant 0 : index
    %c0_7 = arith.constant 0 : index
    %c0_8 = arith.constant 0 : index
    %10 = vector.load %arg2[%c0_6, %c0_7, %c0_8] : memref<1x8x8xi8, #tpu.memory_space<vmem>>, vector<1x8x8xi8>
    %11 = vector.shape_cast %10 : vector<1x8x8xi8> to vector<8x8xi8>
    %c0_i8 = arith.constant 0 : i8
    %12 = vector.broadcast %c0_i8 : i8 to vector<8x8xi8>
    %13 = arith.cmpi ne, %11, %12 : vector<8x8xi8>
    %c0_9 = arith.constant 0 : index
    %c0_10 = arith.constant 0 : index
    %14 = vector.load %arg5[%c0_9, %c0_10] : memref<32x32xf32, #tpu.memory_space<vmem>>, vector<32x32xf32>
    %cst_11 = arith.constant 0.000000e+00 : f32
    %15 = vector.broadcast %cst_11 : f32 to vector<8x32xf32>
    %16 = vector.extract_strided_slice %7 {offsets = [0, 0], sizes = [8, 8], strides = [1, 1]} : vector<8x32xf32> to vector<8x8xf32>
    %17 = vector.extract_strided_slice %8 {offsets = [0, 0], sizes = [8, 8], strides = [1, 1]} : vector<8x32xf32> to vector<8x8xf32>
    %18 = vector.extract_strided_slice %9 {offsets = [0, 0], sizes = [8, 8], strides = [1, 1]} : vector<8x32xf32> to vector<8x8xf32>
    %cst_12 = arith.constant dense<0.000000e+00> : vector<8x8xf32>
    %19 = tpu.matmul %16, %17, %cst_12 {dimension_numbers = #tpu.dot_dimension_numbers<[1], [1], [0], [0], [0, 0, 1, 0], [], []>} : vector<8x8xf32>, vector<8x8xf32>, vector<8x8xf32> -> vector<8x8xf32>
    %cst_13 = arith.constant 0.353553385 : f32
    %20 = vector.broadcast %cst_13 : f32 to vector<8x8xf32>
    %21 = arith.mulf %19, %20 : vector<8x8xf32>
    %cst_14 = arith.constant -1.000000e+09 : f32
    %22 = vector.broadcast %cst_14 : f32 to vector<8x8xf32>
    %23 = arith.select %13, %21, %22 : vector<8x8xi1>, vector<8x8xf32>
    %cst_15 = arith.constant dense<0xFF800000> : vector<8xf32>
    %24 = vector.multi_reduction <maximumf>, %23, %cst_15 [1] : vector<8x8xf32> to vector<8xf32>
    %25 = vector.shape_cast %24 : vector<8xf32> to vector<8x1xf32>
    %26 = vector.broadcast %25 : vector<8x1xf32> to vector<8x8xf32>
    %27 = arith.subf %23, %26 : vector<8x8xf32>
    %28 = math.exp %27 : vector<8x8xf32>
    %cst_16 = arith.constant dense<0.000000e+00> : vector<8xf32>
    %29 = vector.multi_reduction <add>, %28, %cst_16 [1] : vector<8x8xf32> to vector<8xf32>
    %30 = vector.shape_cast %29 : vector<8xf32> to vector<8x1xf32>
    %31 = vector.broadcast %30 : vector<8x1xf32> to vector<8x8xf32>
    %32 = arith.divf %28, %31 : vector<8x8xf32>
    %cst_17 = arith.constant dense<0.000000e+00> : vector<8x8xf32>
    %33 = tpu.matmul %32, %18, %cst_17 {dimension_numbers = #tpu.dot_dimension_numbers<[1], [0], [0], [1], [0, 0, 1, 1], [], []>} : vector<8x8xf32>, vector<8x8xf32>, vector<8x8xf32> -> vector<8x8xf32>
    %34 = vector.extract_strided_slice %14 {offsets = [0, 0], sizes = [8, 32], strides = [1, 1]} : vector<32x32xf32> to vector<8x32xf32>
    %cst_18 = arith.constant dense<0.000000e+00> : vector<8x32xf32>
    %35 = tpu.matmul %33, %34, %cst_18 {dimension_numbers = #tpu.dot_dimension_numbers<[1], [0], [0], [1], [0, 0, 1, 1], [], []>} : vector<8x8xf32>, vector<8x32xf32>, vector<8x32xf32> -> vector<8x32xf32>
    %36 = arith.addf %15, %35 : vector<8x32xf32>
    %37 = vector.extract_strided_slice %7 {offsets = [0, 8], sizes = [8, 8], strides = [1, 1]} : vector<8x32xf32> to vector<8x8xf32>
    %38 = vector.extract_strided_slice %8 {offsets = [0, 8], sizes = [8, 8], strides = [1, 1]} : vector<8x32xf32> to vector<8x8xf32>
    %39 = vector.extract_strided_slice %9 {offsets = [0, 8], sizes = [8, 8], strides = [1, 1]} : vector<8x32xf32> to vector<8x8xf32>
    %cst_19 = arith.constant dense<0.000000e+00> : vector<8x8xf32>
    %40 = tpu.matmul %37, %38, %cst_19 {dimension_numbers = #tpu.dot_dimension_numbers<[1], [1], [0], [0], [0, 0, 1, 0], [], []>} : vector<8x8xf32>, vector<8x8xf32>, vector<8x8xf32> -> vector<8x8xf32>
    %cst_20 = arith.constant 0.353553385 : f32
    %41 = vector.broadcast %cst_20 : f32 to vector<8x8xf32>
    %42 = arith.mulf %40, %41 : vector<8x8xf32>
    %cst_21 = arith.constant -1.000000e+09 : f32
    %43 = vector.broadcast %cst_21 : f32 to vector<8x8xf32>
    %44 = arith.select %13, %42, %43 : vector<8x8xi1>, vector<8x8xf32>
    %cst_22 = arith.constant dense<0xFF800000> : vector<8xf32>
    %45 = vector.multi_reduction <maximumf>, %44, %cst_22 [1] : vector<8x8xf32> to vector<8xf32>
    %46 = vector.shape_cast %45 : vector<8xf32> to vector<8x1xf32>
    %47 = vector.broadcast %46 : vector<8x1xf32> to vector<8x8xf32>
    %48 = arith.subf %44, %47 : vector<8x8xf32>
    %49 = math.exp %48 : vector<8x8xf32>
    %cst_23 = arith.constant dense<0.000000e+00> : vector<8xf32>
    %50 = vector.multi_reduction <add>, %49, %cst_23 [1] : vector<8x8xf32> to vector<8xf32>
    %51 = vector.shape_cast %50 : vector<8xf32> to vector<8x1xf32>
    %52 = vector.broadcast %51 : vector<8x1xf32> to vector<8x8xf32>
    %53 = arith.divf %49, %52 : vector<8x8xf32>
    %cst_24 = arith.constant dense<0.000000e+00> : vector<8x8xf32>
    %54 = tpu.matmul %53, %39, %cst_24 {dimension_numbers = #tpu.dot_dimension_numbers<[1], [0], [0], [1], [0, 0, 1, 1], [], []>} : vector<8x8xf32>, vector<8x8xf32>, vector<8x8xf32> -> vector<8x8xf32>
    %55 = vector.extract_strided_slice %14 {offsets = [8, 0], sizes = [8, 32], strides = [1, 1]} : vector<32x32xf32> to vector<8x32xf32>
    %cst_25 = arith.constant dense<0.000000e+00> : vector<8x32xf32>
    %56 = tpu.matmul %54, %55, %cst_25 {dimension_numbers = #tpu.dot_dimension_numbers<[1], [0], [0], [1], [0, 0, 1, 1], [], []>} : vector<8x8xf32>, vector<8x32xf32>, vector<8x32xf32> -> vector<8x32xf32>
    %57 = arith.addf %36, %56 : vector<8x32xf32>
    %58 = vector.extract_strided_slice %7 {offsets = [0, 16], sizes = [8, 8], strides = [1, 1]} : vector<8x32xf32> to vector<8x8xf32>
    %59 = vector.extract_strided_slice %8 {offsets = [0, 16], sizes = [8, 8], strides = [1, 1]} : vector<8x32xf32> to vector<8x8xf32>
    %60 = vector.extract_strided_slice %9 {offsets = [0, 16], sizes = [8, 8], strides = [1, 1]} : vector<8x32xf32> to vector<8x8xf32>
    %cst_26 = arith.constant dense<0.000000e+00> : vector<8x8xf32>
    %61 = tpu.matmul %58, %59, %cst_26 {dimension_numbers = #tpu.dot_dimension_numbers<[1], [1], [0], [0], [0, 0, 1, 0], [], []>} : vector<8x8xf32>, vector<8x8xf32>, vector<8x8xf32> -> vector<8x8xf32>
    %cst_27 = arith.constant 0.353553385 : f32
    %62 = vector.broadcast %cst_27 : f32 to vector<8x8xf32>
    %63 = arith.mulf %61, %62 : vector<8x8xf32>
    %cst_28 = arith.constant -1.000000e+09 : f32
    %64 = vector.broadcast %cst_28 : f32 to vector<8x8xf32>
    %65 = arith.select %13, %63, %64 : vector<8x8xi1>, vector<8x8xf32>
    %cst_29 = arith.constant dense<0xFF800000> : vector<8xf32>
    %66 = vector.multi_reduction <maximumf>, %65, %cst_29 [1] : vector<8x8xf32> to vector<8xf32>
    %67 = vector.shape_cast %66 : vector<8xf32> to vector<8x1xf32>
    %68 = vector.broadcast %67 : vector<8x1xf32> to vector<8x8xf32>
    %69 = arith.subf %65, %68 : vector<8x8xf32>
    %70 = math.exp %69 : vector<8x8xf32>
    %cst_30 = arith.constant dense<0.000000e+00> : vector<8xf32>
    %71 = vector.multi_reduction <add>, %70, %cst_30 [1] : vector<8x8xf32> to vector<8xf32>
    %72 = vector.shape_cast %71 : vector<8xf32> to vector<8x1xf32>
    %73 = vector.broadcast %72 : vector<8x1xf32> to vector<8x8xf32>
    %74 = arith.divf %70, %73 : vector<8x8xf32>
    %cst_31 = arith.constant dense<0.000000e+00> : vector<8x8xf32>
    %75 = tpu.matmul %74, %60, %cst_31 {dimension_numbers = #tpu.dot_dimension_numbers<[1], [0], [0], [1], [0, 0, 1, 1], [], []>} : vector<8x8xf32>, vector<8x8xf32>, vector<8x8xf32> -> vector<8x8xf32>
    %76 = vector.extract_strided_slice %14 {offsets = [16, 0], sizes = [8, 32], strides = [1, 1]} : vector<32x32xf32> to vector<8x32xf32>
    %cst_32 = arith.constant dense<0.000000e+00> : vector<8x32xf32>
    %77 = tpu.matmul %75, %76, %cst_32 {dimension_numbers = #tpu.dot_dimension_numbers<[1], [0], [0], [1], [0, 0, 1, 1], [], []>} : vector<8x8xf32>, vector<8x32xf32>, vector<8x32xf32> -> vector<8x32xf32>
    %78 = arith.addf %57, %77 : vector<8x32xf32>
    %79 = vector.extract_strided_slice %7 {offsets = [0, 24], sizes = [8, 8], strides = [1, 1]} : vector<8x32xf32> to vector<8x8xf32>
    %80 = vector.extract_strided_slice %8 {offsets = [0, 24], sizes = [8, 8], strides = [1, 1]} : vector<8x32xf32> to vector<8x8xf32>
    %81 = vector.extract_strided_slice %9 {offsets = [0, 24], sizes = [8, 8], strides = [1, 1]} : vector<8x32xf32> to vector<8x8xf32>
    %cst_33 = arith.constant dense<0.000000e+00> : vector<8x8xf32>
    %82 = tpu.matmul %79, %80, %cst_33 {dimension_numbers = #tpu.dot_dimension_numbers<[1], [1], [0], [0], [0, 0, 1, 0], [], []>} : vector<8x8xf32>, vector<8x8xf32>, vector<8x8xf32> -> vector<8x8xf32>
    %cst_34 = arith.constant 0.353553385 : f32
    %83 = vector.broadcast %cst_34 : f32 to vector<8x8xf32>
    %84 = arith.mulf %82, %83 : vector<8x8xf32>
    %cst_35 = arith.constant -1.000000e+09 : f32
    %85 = vector.broadcast %cst_35 : f32 to vector<8x8xf32>
    %86 = arith.select %13, %84, %85 : vector<8x8xi1>, vector<8x8xf32>
    %cst_36 = arith.constant dense<0xFF800000> : vector<8xf32>
    %87 = vector.multi_reduction <maximumf>, %86, %cst_36 [1] : vector<8x8xf32> to vector<8xf32>
    %88 = vector.shape_cast %87 : vector<8xf32> to vector<8x1xf32>
    %89 = vector.broadcast %88 : vector<8x1xf32> to vector<8x8xf32>
    %90 = arith.subf %86, %89 : vector<8x8xf32>
    %91 = math.exp %90 : vector<8x8xf32>
    %cst_37 = arith.constant dense<0.000000e+00> : vector<8xf32>
    %92 = vector.multi_reduction <add>, %91, %cst_37 [1] : vector<8x8xf32> to vector<8xf32>
    %93 = vector.shape_cast %92 : vector<8xf32> to vector<8x1xf32>
    %94 = vector.broadcast %93 : vector<8x1xf32> to vector<8x8xf32>
    %95 = arith.divf %91, %94 : vector<8x8xf32>
    %cst_38 = arith.constant dense<0.000000e+00> : vector<8x8xf32>
    %96 = tpu.matmul %95, %81, %cst_38 {dimension_numbers = #tpu.dot_dimension_numbers<[1], [0], [0], [1], [0, 0, 1, 1], [], []>} : vector<8x8xf32>, vector<8x8xf32>, vector<8x8xf32> -> vector<8x8xf32>
    %97 = vector.extract_strided_slice %14 {offsets = [24, 0], sizes = [8, 32], strides = [1, 1]} : vector<32x32xf32> to vector<8x32xf32>
    %cst_39 = arith.constant dense<0.000000e+00> : vector<8x32xf32>
    %98 = tpu.matmul %96, %97, %cst_39 {dimension_numbers = #tpu.dot_dimension_numbers<[1], [0], [0], [1], [0, 0, 1, 1], [], []>} : vector<8x8xf32>, vector<8x32xf32>, vector<8x32xf32> -> vector<8x32xf32>
    %99 = arith.addf %78, %98 : vector<8x32xf32>
    %c0_40 = arith.constant 0 : index
    %c0_41 = arith.constant 0 : index
    %100 = vector.load %arg8[%c0_40, %c0_41] : memref<8x32xf32, #tpu.memory_space<vmem>>, vector<8x32xf32>
    %101 = vector.extract_strided_slice %100 {offsets = [0, 0], sizes = [1, 32], strides = [1, 1]} : vector<8x32xf32> to vector<1x32xf32>
    %102 = vector.extract_strided_slice %100 {offsets = [1, 0], sizes = [1, 32], strides = [1, 1]} : vector<8x32xf32> to vector<1x32xf32>
    %103 = vector.extract_strided_slice %100 {offsets = [2, 0], sizes = [1, 32], strides = [1, 1]} : vector<8x32xf32> to vector<1x32xf32>
    %104 = vector.extract_strided_slice %100 {offsets = [3, 0], sizes = [1, 32], strides = [1, 1]} : vector<8x32xf32> to vector<1x32xf32>
    %105 = vector.extract_strided_slice %100 {offsets = [4, 0], sizes = [1, 32], strides = [1, 1]} : vector<8x32xf32> to vector<1x32xf32>
    %106 = vector.extract_strided_slice %100 {offsets = [5, 0], sizes = [1, 32], strides = [1, 1]} : vector<8x32xf32> to vector<1x32xf32>
    %107 = vector.extract_strided_slice %100 {offsets = [6, 0], sizes = [1, 32], strides = [1, 1]} : vector<8x32xf32> to vector<1x32xf32>
    %108 = vector.broadcast %101 : vector<1x32xf32> to vector<8x32xf32>
    %109 = arith.addf %99, %108 : vector<8x32xf32>
    %110 = arith.addf %109, %1 : vector<8x32xf32>
    %cst_42 = arith.constant dense<0.000000e+00> : vector<8xf32>
    %111 = vector.multi_reduction <add>, %110, %cst_42 [1] : vector<8x32xf32> to vector<8xf32>
    %112 = vector.shape_cast %111 : vector<8xf32> to vector<8x1xf32>
    %cst_43 = arith.constant 3.200000e+01 : f32
    %113 = vector.broadcast %cst_43 : f32 to vector<8x1xf32>
    %114 = arith.divf %112, %113 : vector<8x1xf32>
    %115 = vector.broadcast %114 : vector<8x1xf32> to vector<8x32xf32>
    %116 = arith.subf %110, %115 : vector<8x32xf32>
    %117 = arith.mulf %116, %116 : vector<8x32xf32>
    %cst_44 = arith.constant dense<0.000000e+00> : vector<8xf32>
    %118 = vector.multi_reduction <add>, %117, %cst_44 [1] : vector<8x32xf32> to vector<8xf32>
    %119 = vector.shape_cast %118 : vector<8xf32> to vector<8x1xf32>
    %cst_45 = arith.constant 3.200000e+01 : f32
    %120 = vector.broadcast %cst_45 : f32 to vector<8x1xf32>
    %121 = arith.divf %119, %120 : vector<8x1xf32>
    %cst_46 = arith.constant 9.99999974E-6 : f32
    %122 = vector.broadcast %cst_46 : f32 to vector<8x1xf32>
    %123 = arith.addf %121, %122 : vector<8x1xf32>
    %124 = math.rsqrt %123 : vector<8x1xf32>
    %125 = vector.broadcast %114 : vector<8x1xf32> to vector<8x32xf32>
    %126 = arith.subf %110, %125 : vector<8x32xf32>
    %127 = vector.broadcast %124 : vector<8x1xf32> to vector<8x32xf32>
    %128 = arith.mulf %126, %127 : vector<8x32xf32>
    %129 = vector.broadcast %104 : vector<1x32xf32> to vector<8x32xf32>
    %130 = arith.mulf %128, %129 : vector<8x32xf32>
    %131 = vector.broadcast %105 : vector<1x32xf32> to vector<8x32xf32>
    %132 = arith.addf %130, %131 : vector<8x32xf32>
    %c0_47 = arith.constant 0 : index
    %c0_48 = arith.constant 0 : index
    %133 = vector.load %arg6[%c0_47, %c0_48] : memref<32x32xf32, #tpu.memory_space<vmem>>, vector<32x32xf32>
    %cst_49 = arith.constant dense<0.000000e+00> : vector<8x32xf32>
    %134 = tpu.matmul %132, %133, %cst_49 {dimension_numbers = #tpu.dot_dimension_numbers<[1], [0], [0], [1], [0, 0, 1, 1], [], []>} : vector<8x32xf32>, vector<32x32xf32>, vector<8x32xf32> -> vector<8x32xf32>
    %135 = vector.broadcast %102 : vector<1x32xf32> to vector<8x32xf32>
    %136 = arith.addf %134, %135 : vector<8x32xf32>
    %cst_50 = arith.constant 0.000000e+00 : f32
    %137 = vector.broadcast %cst_50 : f32 to vector<8x32xf32>
    %138 = arith.maximumf %136, %137 : vector<8x32xf32>
    %c0_51 = arith.constant 0 : index
    %c0_52 = arith.constant 0 : index
    %139 = vector.load %arg7[%c0_51, %c0_52] : memref<32x32xf32, #tpu.memory_space<vmem>>, vector<32x32xf32>
    %cst_53 = arith.constant dense<0.000000e+00> : vector<8x32xf32>
    %140 = tpu.matmul %138, %139, %cst_53 {dimension_numbers = #tpu.dot_dimension_numbers<[1], [0], [0], [1], [0, 0, 1, 1], [], []>} : vector<8x32xf32>, vector<32x32xf32>, vector<8x32xf32> -> vector<8x32xf32>
    %141 = vector.broadcast %103 : vector<1x32xf32> to vector<8x32xf32>
    %142 = arith.addf %140, %141 : vector<8x32xf32>
    %143 = arith.addf %132, %142 : vector<8x32xf32>
    %cst_54 = arith.constant dense<0.000000e+00> : vector<8xf32>
    %144 = vector.multi_reduction <add>, %143, %cst_54 [1] : vector<8x32xf32> to vector<8xf32>
    %145 = vector.shape_cast %144 : vector<8xf32> to vector<8x1xf32>
    %cst_55 = arith.constant 3.200000e+01 : f32
    %146 = vector.broadcast %cst_55 : f32 to vector<8x1xf32>
    %147 = arith.divf %145, %146 : vector<8x1xf32>
    %148 = vector.broadcast %147 : vector<8x1xf32> to vector<8x32xf32>
    %149 = arith.subf %143, %148 : vector<8x32xf32>
    %150 = arith.mulf %149, %149 : vector<8x32xf32>
    %cst_56 = arith.constant dense<0.000000e+00> : vector<8xf32>
    %151 = vector.multi_reduction <add>, %150, %cst_56 [1] : vector<8x32xf32> to vector<8xf32>
    %152 = vector.shape_cast %151 : vector<8xf32> to vector<8x1xf32>
    %cst_57 = arith.constant 3.200000e+01 : f32
    %153 = vector.broadcast %cst_57 : f32 to vector<8x1xf32>
    %154 = arith.divf %152, %153 : vector<8x1xf32>
    %cst_58 = arith.constant 9.99999974E-6 : f32
    %155 = vector.broadcast %cst_58 : f32 to vector<8x1xf32>
    %156 = arith.addf %154, %155 : vector<8x1xf32>
    %157 = math.rsqrt %156 : vector<8x1xf32>
    %158 = vector.broadcast %147 : vector<8x1xf32> to vector<8x32xf32>
    %159 = arith.subf %143, %158 : vector<8x32xf32>
    %160 = vector.broadcast %157 : vector<8x1xf32> to vector<8x32xf32>
    %161 = arith.mulf %159, %160 : vector<8x32xf32>
    %162 = vector.broadcast %106 : vector<1x32xf32> to vector<8x32xf32>
    %163 = arith.mulf %161, %162 : vector<8x32xf32>
    %164 = vector.broadcast %107 : vector<1x32xf32> to vector<8x32xf32>
    %165 = arith.addf %163, %164 : vector<8x32xf32>
    %c0_59 = arith.constant 0 : index
    %c0_60 = arith.constant 0 : index
    %c0_61 = arith.constant 0 : index
    %166 = vector.load %arg9[%c0_59, %c0_60, %c0_61] : memref<1x8x32xf32, #tpu.memory_space<vmem>>, vector<1x8x32xf32>
    %167 = vector.shape_cast %166 : vector<1x8x32xf32> to vector<8x32xf32>
    %168 = vector.shape_cast %165 : vector<8x32xf32> to vector<1x8x32xf32>
    tpu.vector_store %arg9[%c0_59, %c0_60, %c0_61], %168 {strides = array<i32>} : memref<1x8x32xf32, #tpu.memory_space<vmem>>, vector<1x8x32xf32>,
    return
  }
  func.func @transform_0(%arg0: i32) -> (i32, i32, i32) {
    %c0_i32 = arith.constant 0 : i32
    %c0_i32_0 = arith.constant 0 : i32
    %c0_i32_1 = arith.constant 0 : i32
    return %arg0, %c0_i32, %c0_i32_0 : i32, i32, i32
  }
  func.func @transform_1(%arg0: i32) -> (i32, i32, i32) {
    %c0_i32 = arith.constant 0 : i32
    %c0_i32_0 = arith.constant 0 : i32
    %c0_i32_1 = arith.constant 0 : i32
    return %arg0, %c0_i32, %c0_i32_0 : i32, i32, i32
  }
  func.func @transform_2(%arg0: i32) -> (i32, i32) {
    %c0_i32 = arith.constant 0 : i32
    %c0_i32_0 = arith.constant 0 : i32
    %c0_i32_1 = arith.constant 0 : i32
    return %c0_i32, %c0_i32_0 : i32, i32
  }
  func.func @transform_3(%arg0: i32) -> (i32, i32) {
    %c0_i32 = arith.constant 0 : i32
    %c0_i32_0 = arith.constant 0 : i32
    %c0_i32_1 = arith.constant 0 : i32
    return %c0_i32, %c0_i32_0 : i32, i32
  }
  func.func @transform_4(%arg0: i32) -> (i32, i32) {
    %c0_i32 = arith.constant 0 : i32
    %c0_i32_0 = arith.constant 0 : i32
    %c0_i32_1 = arith.constant 0 : i32
    return %c0_i32, %c0_i32_0 : i32, i32
  }
  func.func @transform_5(%arg0: i32) -> (i32, i32) {
    %c0_i32 = arith.constant 0 : i32
    %c0_i32_0 = arith.constant 0 : i32
    %c0_i32_1 = arith.constant 0 : i32
    return %c0_i32, %c0_i32_0 : i32, i32
  }
  func.func @transform_6(%arg0: i32) -> (i32, i32) {
    %c0_i32 = arith.constant 0 : i32
    %c0_i32_0 = arith.constant 0 : i32
    %c0_i32_1 = arith.constant 0 : i32
    return %c0_i32, %c0_i32_0 : i32, i32
  }
  func.func @transform_7(%arg0: i32) -> (i32, i32) {
    %c0_i32 = arith.constant 0 : i32
    %c0_i32_0 = arith.constant 0 : i32
    %c0_i32_1 = arith.constant 0 : i32
    return %c0_i32, %c0_i32_0 : i32, i32
  }
  func.func @transform_8(%arg0: i32) -> (i32, i32, i32) {
    %c0_i32 = arith.constant 0 : i32
    %c0_i32_0 = arith.constant 0 : i32
    %c0_i32_1 = arith.constant 0 : i32
    return %arg0, %c0_i32, %c0_i32_0 : i32, i32, i32
  }
}

</mosaic_0001>

<bundles_post_ra>
// kernel: tpu_custom_call.1
= control target key start
LH: loop header
LB: loop body
LE: loop exit
PB: predicated region body
PF: predicated region fallthrough
CT: control target
= control target key end

     0   :  { %s2970_s0 = inlined_call_operand.hbm [shape: f32[2,8,32], index: 0, kind: input, shape index: {}]   ;;  %s2971_s1 = inlined_call_operand.hbm [shape: s8[2,8,8], index: 1, kind: input, shape index: {}]   ;;  %s2972_s2 = inlined_call_operand.hbm [shape: f32[32,96], index: 2, kind: input, shape index: {}]   ;;  %s2973_s3 = inlined_call_operand.vmem [shape: f32[1,96], index: 3, kind: input, shape index: {}]   ;;  %s2974_s4 = inlined_call_operand.hbm [shape: f32[32,32], index: 4, kind: input, shape index: {}]   ;;  %s2975_s5 = inlined_call_operand.hbm [shape: f32[32,32], index: 5, kind: input, shape index: {}]   ;;  %s2976_s6 = inlined_call_operand.hbm [shape: f32[32,32], index: 6, kind: input, shape index: {}]   ;;  %s2977_s7 = inlined_call_operand.vmem [shape: f32[8,32], index: 7, kind: input, shape index: {}]   ;;  %s2978_s8 = inlined_call_operand.hbm [shape: f32[2,8,32], index: 8, kind: output, shape index: {}]  }
   0x1   :  { %2983 = sst [smem:[#allocation20_spill]] %s2970_s0 }
   0x2   :  { %2984 = sst [smem:[#allocation21_spill]] %s2972_s2 }
   0x3   :  { %2985 = sst [smem:[#allocation22_spill]] %s2974_s4 }
   0x4   :  { %2986 = sst [smem:[#allocation23_spill]] %s2975_s5 }
   0x5   :  { %13 = vsyncpa [#allocation3], 0 }
   0x6   :  { %15 = vsyncpa [#allocation3 + $0x1], 0 }
   0x7   :  { %16 = vsyncpa [#allocation6], 0 }
   0x8   :  { %18 = vsyncpa [#allocation6 + $0x1], 0 }
   0x9   :  { %19 = vsyncpa [#allocation9], 0 }
   0xa   :  { %20 = vsyncpa [#allocation12], 0 }
   0xb   :  { %21 = vsyncpa [#allocation4], 0 }
   0xc   :  { %23 = vsyncpa [#allocation4 + $0x1], 0  ;;  %s2486_s27 = smov 0   ;;  %s2488_s28 = smov 0  }
   0xd   :  { %s2490_s29 = smov 0   ;;  %s2492_s30 = smov 0  }
   0xe LB: > { %s2417_s9 = smov [#allocation7]   ;;  %s2507_s11 = sadd.s32 4294967295, %s2415_s30   ;;  %s2415_s30 = sphi %s2492_s30, %s3017_s30   ;;  %s2411_s29 = sphi %s2490_s29, %s3016_s29   ;;  %s2407_s28 = sphi %s2488_s28, %s3015_s28   ;;  %s2403_s27 = sphi %s2486_s27, %s3014_s27  }
   0xf   : > { %s250_s10 = sshll.u32 %s2417_s9, 4  ;;  %p1840_p0 = scmp.ge.s32.totalorder %s2415_s30, 1  ;;  %s2512_s10 = int_to_ptr.vmem [resolvable:$true] %s250_s10 }
  0x10   : > { %p2979_p1 = scmp.eq.s32.totalorder %s2507_s11, 0  ;;  %p238_p2 = scmp.lt.s32.totalorder %s2415_s30, 3 }
  0x11   : > { %s2418_s13 = smov [#allocation8]   ;;  %s2419_s16 = smov [#allocation10]  }
  0x12   : > { %p2514_p3 = pnand %p1840_p0, %p238_p2  ;;  %s266_s14 = sshll.u32 %s2418_s13, 4  ;;  %s2527_s14 = int_to_ptr.vmem [resolvable:$true] %s266_s14 }
  0x13   : > { %s279_s17 = sshll.u32 %s2419_s16, 4  ;;  %s2989_s2 = sld [smem:[#allocation21_spill]]  ;;  %s2529_s17 = int_to_ptr.vmem [resolvable:$true] %s279_s17 }
  0x14   : > { %s2987_s12 = scalar_select %p2514_p3, 1, 0 }
  0x15   : > { %p2054_p5 = pneg %p2514_p3 }
  0x17   : > { %p2523_p6 = pnand %p2054_p5, %p2979_p1 }
  0x19   : > { %s2161_s20 = scalar_lea.hbm %s2989_s2, 512  ;;  %p2539_p8 = pneg %p2523_p6 }
  0x1a   : > { %p2162_p7 = scmp.ne.s32.totalorder %s2989_s2, %s2161_s20  ;;  %p2168_p11 = scmp.lt.u32.totalorder %s2161_s20, %s2989_s2 }
  0x1c   : > { %p2164_p9 = pnand %p2539_p8, %p2162_p7 }
  0x1e   : > { %p2165_p10 = pneg %p2164_p9 }
  0x20   : > { %p2170_p12 = pnand %p2168_p11, %p2165_p10 }
  0x22   : > { %2173 = shalt.err (!%p2170_p12)
}
  0x23   : > { %s2174_s26 = scalar_lea.vmem %s2512_s10, 512  ;;  %p2182_p5 = scmp.lt.s32.totalorder %s2512_s10, %s2512_s10 }
  0x24   : > { %p2175_p13 = scmp.ne.s32.totalorder %s2512_s10, %s2174_s26  ;;  %p2183_p4 = scmp.lt.s32.totalorder %s2174_s26, %s2174_s26 }
  0x26   : > { %p2177_p0 = pnand %p2175_p13, %p2539_p8  ;;  %p2184_p7 = por %p2183_p4, %p2182_p5 }
  0x28   : > { %p2178_p2 = pneg %p2177_p0 }
  0x2a   : > { %p2185_p9 = pnand %p2184_p7, %p2178_p2 }
  0x2c   : > { %2188 = shalt.err (!%p2185_p9)
}
  0x2d   : > { %s2420_s9 = smov 128   ;;  %s2421_s13 = smov 8  }
  0x2e   : > { %2057 = dma.hbm_to_vmem [thread:$0]  (!%p2523_p6), %s2989_s2, 512, %s2512_s10, [#allocation6], %s2420_s9, %s2420_s9, %s2421_s13  }
  0x2f   : > { %s2991_s4 = sld [smem:[#allocation22_spill]] }
  0x35   : > { %s2189_s21 = scalar_lea.hbm %s2991_s4, 512 }
  0x36   : > { %p2190_p4 = scmp.ne.s32.totalorder %s2991_s4, %s2189_s21  ;;  %p2196_p12 = scmp.lt.u32.totalorder %s2189_s21, %s2991_s4 }
  0x38   : > { %p2192_p10 = pnand %p2190_p4, %p2539_p8 }
  0x3a   : > { %p2193_p11 = pneg %p2192_p10 }
  0x3c   : > { %p2198_p13 = pnand %p2196_p12, %p2193_p11 }
  0x3e   : > { %2201 = shalt.err (!%p2198_p13)
}
  0x3f   : > { %s2202_s10 = scalar_lea.vmem %s2527_s14, 512  ;;  %p2210_p7 = scmp.lt.s32.totalorder %s2527_s14, %s2527_s14 }
  0x40   : > { %p2203_p0 = scmp.ne.s32.totalorder %s2527_s14, %s2202_s10  ;;  %p2211_p9 = scmp.lt.s32.totalorder %s2202_s10, %s2202_s10 }
  0x42   : > { %p2205_p2 = pnand %p2203_p0, %p2539_p8  ;;  %p2212_p4 = por %p2211_p9, %p2210_p7 }
  0x44   : > { %p2206_p5 = pneg %p2205_p2 }
  0x46   : > { %p2213_p10 = pnand %p2212_p4, %p2206_p5 }
  0x48   : > { %2216 = shalt.err (!%p2213_p10)
}
  0x49   : > { %2060 = dma.hbm_to_vmem [thread:$0]  (!%p2523_p6), %s2991_s4, 512, %s2527_s14, [#allocation9], %s2420_s9, %s2420_s9, %s2421_s13  }
  0x4a   : > { %s2992_s5 = sld [smem:[#allocation23_spill]] }
  0x50   : > { %s2217_s21 = scalar_lea.hbm %s2992_s5, 512 }
  0x51   : > { %p2218_p11 = scmp.ne.s32.totalorder %s2992_s5, %s2217_s21  ;;  %p2224_p0 = scmp.lt.u32.totalorder %s2217_s21, %s2992_s5 }
  0x53   : > { %p2220_p12 = pnand %p2218_p11, %p2539_p8 }
  0x55   : > { %p2221_p13 = pneg %p2220_p12 }
  0x57   : > { %p2226_p2 = pnand %p2224_p0, %p2221_p13 }
  0x59   : > { %2229 = shalt.err (!%p2226_p2)
}
  0x5a   : > { %s2230_s14 = scalar_lea.vmem %s2529_s17, 512  ;;  %p2238_p4 = scmp.lt.s32.totalorder %s2529_s17, %s2529_s17 }
  0x5b   : > { %p2231_p5 = scmp.ne.s32.totalorder %s2529_s17, %s2230_s14  ;;  %p2239_p10 = scmp.lt.s32.totalorder %s2230_s14, %s2230_s14 }
  0x5d   : > { %p2233_p7 = pnand %p2231_p5, %p2539_p8  ;;  %p2240_p11 = por %p2239_p10, %p2238_p4 }
  0x5f   : > { %p2234_p9 = pneg %p2233_p7 }
  0x61   : > { %p2241_p12 = pnand %p2240_p11, %p2234_p9 }
  0x63   : > { %2244 = shalt.err (!%p2241_p12)
}
  0x64   : > { %2063 = dma.hbm_to_vmem [thread:$0]  (!%p2523_p6), %s2992_s5, 512, %s2529_s17, [#allocation9], %s2420_s9, %s2420_s9, %s2421_s13  }
  0x65   : > { %s2422_s18 = smov [#allocation11]   ;;  %s2245_s22 = scalar_lea.hbm %s2976_s6, 512 }
  0x66   : > { %s292_s19 = sshll.u32 %s2422_s18, 4  ;;  %p2246_p13 = scmp.ne.s32.totalorder %s2976_s6, %s2245_s22  ;;  %s293_s19 = int_to_ptr.vmem [resolvable:$true] %s292_s19 }
  0x67   : > { %p2252_p5 = scmp.lt.u32.totalorder %s2245_s22, %s2976_s6 }
  0x68   : > { %p2248_p0 = pnand %p2246_p13, %p2539_p8 }
  0x6a   : > { %p2249_p2 = pneg %p2248_p0 }
  0x6c   : > { %p2254_p7 = pnand %p2252_p5, %p2249_p2 }
  0x6e   : > { %2257 = shalt.err (!%p2254_p7)
}
  0x6f   : > { %s2258_s17 = scalar_lea.vmem %s293_s19, 512  ;;  %p2266_p11 = scmp.lt.s32.totalorder %s293_s19, %s293_s19 }
  0x70   : > { %p2259_p9 = scmp.ne.s32.totalorder %s293_s19, %s2258_s17  ;;  %p2267_p12 = scmp.lt.s32.totalorder %s2258_s17, %s2258_s17 }
  0x72   : > { %p2261_p4 = pnand %p2259_p9, %p2539_p8  ;;  %p2268_p1 = por %p2267_p12, %p2266_p11 }
  0x74   : > { %p2262_p10 = pneg %p2261_p4 }
  0x76   : > { %p2269_p3 = pnand %p2268_p1, %p2262_p10 }
  0x78   : > { %2272 = shalt.err (!%p2269_p3)
}
  0x79   : > { %2066 = dma.hbm_to_vmem [thread:$0]  (!%p2523_p6), %s2976_s6, 512, %s293_s19, [#allocation12], %s2420_s9, %s2420_s9, %s2421_s13  }
  0x7a   : > { %s1839_s15 = sadd.s32 4294967294, %s2415_s30   ;;  %s2638_s23 = sadd.s32 1, %s2415_s30  }
  0x7b   : > { %s33_s18 = ssub.s32 %s2415_s30, %s2638_s23  ;;  %s36_s20 = sadd.s32 1, %s2411_s29 }
  0x7c   : > { %p34_p1 = scmp.eq.s32.totalorder %s33_s18, 0  ;;  %p43_p3 = scmp.ne.s32.totalorder %s2411_s29, %s2407_s28 }
  0x7d   : > { %p44_p8 = scmp.eq.s32.totalorder %s2415_s30, 0  ;;  %p49_p13 = scmp.ne.s32.totalorder %s2407_s28, %s2403_s27 }
  0x7e   : > { %s2649_s21 = scalar_select %p34_p1, %s2411_s29, %s36_s20  }
  0x7f   : > { %p2651_p0 = por %p44_p8, %p43_p3  ;;  %p2994_p2 = scmp.eq.s32.totalorder %s2507_s11, 0 }
  0x80   : > { %p225_p5 = scmp.eq.s32.totalorder %s2507_s11, 1  ;;  %p231_p7 = scmp.eq.s32.totalorder %s1839_s15, 1 }
  0x81   : > { %p2657_p6 = por %p2994_p2, %p49_p13  ;;  %p2082_p9 = scmp.lt.s32.totalorder %s2415_s30, 2 }
  0x82   : > { %s2664_s13 = sand.u32 1, %s2411_s29   ;;  %p2666_p4 = por %p225_p5, %p43_p3 }
  0x83   : > { %s2995_s9 = scalar_select %p2657_p6, 1, 0 }
  0x84   : > { %s2996_s19 = scalar_select %p2666_p4, 1, 0 }
  0x85   : > { %p2670_p10 = por %p231_p7, %p49_p13  ;;  %s1846_s25 = sshll.u32 %s2664_s13, 3 }
  0x86   : > { %s1847_s26 = sshll.u32 %s2415_s30, 7  ;;  %s2998_s0 = sld [smem:[#allocation20_spill]] }
  0x87   : > { %s2997_s24 = scalar_select %p2670_p10, 1, 0 }
  0x88   : > { %s313_s16 = scalar_lea.vmem [#allocation2], %s1846_s25  ;;  %p2685_p11 = pnand %p2082_p9, %p2651_p0 }
  0x89   : > { %s320_s15 = sshll.u32 %s313_s16, 4  ;;  %s1848_s2 = sshll.u32 %s2664_s13, 1  ;;  %s2681_s15 = int_to_ptr.vmem [resolvable:$true] %s320_s15 }
  0x8a   : > { %s310_s14 = scalar_lea.sflag [#allocation3], %s2664_s13  ;;  %p2275_p1 = pneg %p2685_p11 }
  0x8c   : > { %s2679_s10 = scalar_lea.hbm %s2998_s0, %s1847_s26  ;;  %s2278_s22 = scalar_lea.hbm %s2998_s0, 256 }
  0x8d   : > { %s2273_s26 = scalar_lea.hbm %s2679_s10, 128  ;;  %p2279_p13 = scmp.lt.u32.totalorder %s2679_s10, %s2998_s0 }
  0x8e   : > { %p2274_p12 = scmp.ne.s32.totalorder %s2679_s10, %s2273_s26  ;;  %p2280_p0 = scmp.lt.u32.totalorder %s2278_s22, %s2273_s26 }
  0x8f   : > { %p2282_p5 = scmp.lt.u32.totalorder %s2273_s26, %s2679_s10 }
  0x90   : > { %p2276_p3 = pnand %p2275_p1, %p2274_p12  ;;  %p2281_p2 = por %p2280_p0, %p2279_p13 }
  0x92   : > { %p2277_p8 = pneg %p2276_p3  ;;  %p2283_p7 = por %p2282_p5, %p2281_p2 }
  0x94   : > { %p2284_p9 = pnand %p2283_p7, %p2277_p8 }
  0x96   : > { %2287 = shalt.err (!%p2284_p9)
}
  0x97   : > { %s2288_s20 = scalar_lea.vmem %s2681_s15, 128  ;;  %s2423_s25 = smov [#allocation2]  }
  0x98   : > { %p2289_p12 = scmp.ne.s32.totalorder %s2681_s15, %s2288_s20  ;;  %s2293_s17 = sshll.u32 %s2423_s25, 4  ;;  %s2294_s17 = int_to_ptr.vmem [resolvable:$false] %s2293_s17 }
  0x99   : > { %s2295_s4 = scalar_lea.vmem %s2294_s17, 256  ;;  %p2296_p4 = scmp.lt.s32.totalorder %s2681_s15, %s2294_s17 }
  0x9a   : > { %p2291_p3 = pnand %p2289_p12, %p2275_p1  ;;  %p2297_p13 = scmp.lt.s32.totalorder %s2295_s4, %s2288_s20 }
  0x9c   : > { %p2292_p10 = pneg %p2291_p3  ;;  %p2298_p0 = por %p2297_p13, %p2296_p4 }
  0x9e   : > { %p2299_p2 = pnand %p2298_p0, %p2292_p10 }
  0xa0   : > { %2302 = shalt.err (!%p2299_p2)
}
  0xa1   : > { %2070 = dma.hbm_to_vmem [thread:$0]  (!%p2685_p11), %s2679_s10, 128, %s2681_s15, %s310_s14  }
  0xa2   : > { %s1849_s26 = sshll.u32 %s2415_s30, 5  ;;  %s331_s20 = scalar_lea.vmem [#allocation5], %s1848_s2 }
  0xa3   : > { %s2721_s25 = scalar_lea.hbm %s2971_s1, %s1849_s26  ;;  %s338_s17 = sshll.u32 %s331_s20, 4  ;;  %s339_s17 = int_to_ptr.vmem [resolvable:$true] %s338_s17 }
  0xa4   : > { %s3000_s4 = sand.u32 1, %s2415_s30   ;;  %s2303_s5 = scalar_lea.hbm %s2721_s25, 32 }
  0xa5   : > { %s328_s0 = scalar_lea.sflag [#allocation6], %s3000_s4  ;;  %p2304_p4 = scmp.ne.s32.totalorder %s2721_s25, %s2303_s5 }
  0xa6   : > { %s2308_s14 = scalar_lea.hbm %s2971_s1, 64  ;;  %p2309_p5 = scmp.lt.u32.totalorder %s2721_s25, %s2971_s1 }
  0xa7   : > { %p2306_p10 = pnand %p2304_p4, %p2275_p1  ;;  %p2310_p7 = scmp.lt.u32.totalorder %s2308_s14, %s2303_s5 }
  0xa8   : > { %p2312_p12 = scmp.lt.u32.totalorder %s2303_s5, %s2721_s25 }
  0xa9   : > { %p2307_p8 = pneg %p2306_p10  ;;  %p2311_p9 = por %p2310_p7, %p2309_p5 }
  0xab   : > { %p2313_p3 = por %p2312_p12, %p2311_p9 }
  0xad   : > { %p2314_p13 = pnand %p2313_p3, %p2307_p8 }
  0xaf   : > { %2317 = shalt.err (!%p2314_p13)
}
  0xb0   : > { %s2318_s2 = scalar_lea.vmem %s339_s17, 32  ;;  %s2424_s22 = smov [#allocation5]  }
  0xb1   : > { %p2319_p0 = scmp.ne.s32.totalorder %s339_s17, %s2318_s2  ;;  %s2323_s16 = sshll.u32 %s2424_s22, 4  ;;  %s2324_s16 = int_to_ptr.vmem [resolvable:$false] %s2323_s16 }
  0xb2   : > { %s2325_s20 = scalar_lea.vmem %s2324_s16, 64  ;;  %p2326_p10 = scmp.lt.s32.totalorder %s339_s17, %s2324_s16 }
  0xb3   : > { %p2321_p2 = pnand %p2319_p0, %p2275_p1  ;;  %p2327_p6 = scmp.lt.s32.totalorder %s2325_s20, %s2318_s2 }
  0xb5   : > { %p2322_p4 = pneg %p2321_p2  ;;  %p2328_p5 = por %p2327_p6, %p2326_p10 }
  0xb7   : > { %p2329_p7 = pnand %p2328_p5, %p2322_p4 }
  0xb9   : > { %2332 = shalt.err (!%p2329_p7)
}
  0xba   : > { %2073 = dma.hbm_to_vmem [thread:$0]  (!%p2685_p11), %s2721_s25, 32, %s339_s17, %s328_s0  }
  0xbb   : > { %p3001_p8 = scmp.ne.s32.totalorder %s2987_s12, 0 }
  0xbc   : > { %s2749_s5 = sand.u32 (!%p3001_p8), 1, %s2407_s28   ;;  %p3002_p6 = scmp.ne.s32.totalorder (!%p3001_p8), %s2995_s9, 0 }
  0xbd   : > { %347 = sbr.rel (%p3001_p8) target bundleno = 3866 (0xf1a), region = 52  ;;  %s1851_s4 = sshll.u32 (!%p3001_p8), %s2749_s5, 3 }
  0xbe   : > { %s350_s10 = scalar_lea.sflag (!%p3001_p8), [#allocation3], %s2749_s5  ;;  %s2755_s15 = scalar_lea.vmem (!%p3001_p8), [#allocation2], %s1851_s4 }
  0xc4   : > { %2378 = dma.done.wait (%p3002_p6), %s350_s10, 128  }
  0xc5   : > { %2380 = vsyncadd (%p3002_p6), %s350_s10, 4294967168  ;;  %s358_s0 = sand.u32 1, %s2507_s11   ;;  %s1852_s12 = sshll.u32 %s2749_s5, 1 }
  0xc6   : > { %s359_s18 = scalar_lea.sflag [#allocation6], %s358_s0  ;;  %s2763_s25 = scalar_lea.vmem [#allocation5], %s1852_s12 }
  0xc7   : > { %2382 = dma.done.wait (%p3002_p6), %s359_s18, 32  }
  0xc8   : > { %2384 = vsyncadd (%p3002_p6), %s359_s18, 4294967264  ;;  %p3003_p11 = scmp.eq.s32.totalorder %s2507_s11, 0 }
  0xca   : > { %2386 = dma.done.wait (%p3003_p11), [#allocation6], 512   ;;  %p3004_p1 = pmov %p3003_p11 }
  0xcc   : > { %2388 = vsyncadd (%p3004_p1), [#allocation6], 4294966784  ;;  %p3005_p9 = pmov %p3004_p1 }
  0xcd   : > { %p3006_p12 = pmov %p3004_p1 }
  0xce   : > { %2390 = dma.done.wait (%p3005_p9), [#allocation9], 1024  }
  0xcf   : > { %2392 = vsyncadd (%p3006_p12), [#allocation9], 4294966272  ;;  %p3007_p3 = pmov %p3004_p1 }
  0xd0   : > { %p3008_p13 = pmov %p3004_p1 }
  0xd1   : > { %2394 = dma.done.wait (%p3007_p3), [#allocation12], 512  }
  0xd2   : > { %2396 = vsyncadd (%p3008_p13), [#allocation12], 4294966784  ;;  %v2425_v0 = vmov 0.0|0.0   ;;  %vm2426_vm0 = vmmov 0   ;;  %v2427_v1 = vmov 0.0   ;;  %v419_v2 = vld [vmem:[#allocation7] sm:$0xff] }
  0xd3   : > { %2014 = vmatprep.subr.bf16.mxu0 %v2425_v0  ;;  %1929 = vmatprep.mubr.msk.f32.mxu0 %vm2426_vm0, %v2427_v1  ;;  %v420_v3 = vld [vmem:[#allocation7 + $0x8] sm:$0xff]  ;;  %v421_v4 = vld [vmem:[#allocation7 + $0x10] sm:$0xff]  ;;  %v422_v6 = vld [vmem:[#allocation7 + $0x18] sm:$0xff]  ;;  %vm430_vm1 = vcmask 261120   ;;  %s2428_s14 = smov 120   ;;  %s2429_s13 = smov 96  }
  0xd4   : > { %1932 = vmatprep.subr.mxu1 %v2427_v1  ;;  %1934 = vmatprep.mubr.msk.f32.mxu1 %vm2426_vm0, %v2427_v1  ;;  %v2015_v5 = vpack.c.bf16 %v420_v3, %v419_v2  ;;  %v2018_v7 = vpack.c.bf16 %v422_v6, %v421_v4  ;;  %v2789_v8 = vld [vmem:[%s2755_s15] sm:$0xff]  ;;  %s2430_s26 = smov 88   ;;  %vm513_vm2 = vcmask 64512   ;;  %v504_v16 = vld [vmem:[%s2763_s25] sm:$0x3]  ;;  %v2431_v17 = vmov 0  }
  0xd5   : > { %v1858_v9 = vld [vmem:[%s2973_s3] ss:$0 sm:$0xff]  ;;  %vm505_vm3 = vnez %v504_v16  ;;  %s2432_s2 = smov 56   ;;  %s2433_s22 = smov 64   ;;  %v506_v50 = vld [vmem:[#allocation8] sm:$0xff]  ;;  %v509_v21 = vld [vmem:[#allocation8 + $0x18] sm:$0xff] }
  0xd6   : > { %2016 = vmatpush3.bf16.msra.mxu0 %v2015_v5  ;;  %v589_v18 = vsel %vm505_vm3, 16843009, %v2431_v17  ;;  %s2434_s16 = smov 80   ;;  %s2435_s20 = smov 112   ;;  %v507_v41 = vld [vmem:[#allocation8 + $0x8] sm:$0xff] }
  0xd7   : > { %2017 = vmatprep.subr.bf16.mxu0 %v2425_v0  ;;  %v590_v19 = vunpack.c.0.s8 %v589_v18  ;;  %s2436_s10 = smov 72   ;;  %s2437_s15 = smov 104   ;;  %v508_v18 = vld [vmem:[#allocation8 + $0x10] sm:$0xff] }
  0xd8   : > { %s2438_s0 = smov 48   ;;  %s2439_s12 = smov 40  }
  0xd9   : > { %vm2816_vm4 = vcmp.ne.s32.totalorder %v590_v19, 0  ;;  %s1879_s9 = sshll.u32 %s2507_s11, 7  ;;  %s415_s17 = scalar_lea.vmem [#allocation13], %s1851_s4 }
  0xda   : > { %2019 = vmatpush3.bf16.msra.mxu0 %v2018_v7  ;;  %p3011_p2 = scmp.ne.s32.totalorder %s2996_s19, 0  ;;  %s2440_s11 = smov [#allocation13]  }
  0xdb   : > { %1942 = vmatprep.subr.mxu0 %v2427_v1  ;;  %s2337_s4 = sshll.u32 %s2440_s11, 4  ;;  %s2338_s4 = int_to_ptr.vmem [resolvable:$false] %s2337_s4 }
  0xdd   : > { %1930 = vmatmul.mubr.msk.f32.vlgmr.msra.gmra.mrb[0].mxu0 %vm430_vm1, %v2789_v8 }
  0xde   : > { %1944 = vmatprep.mubr.msk.f32.mxu0 %vm2426_vm0, %v2427_v1 }
 0x1b0   : > { %v500_v10 = vpop.f32.mrb[0].mxu0 }
 0x1b1   : > { %v2799_v11 = vadd.f32 %v1858_v9, %v500_v10  ;;  %v1931_v12 = vpop.f32.mrb[1].mxu0 }
 0x1b3   : > { %680 = vrot.lane.b32.xlu1 %v2799_v11, %s2428_s14  ;;  %511 = vrot.lane.b32.xlu0 %v2799_v11, %s2429_s13  ;;  %s1708_s14 = sshll.u32 %s415_s17, 4  ;;  %s2927_s14 = int_to_ptr.vmem [resolvable:$true] %s1708_s14 }
 0x1b4   : > { %p2340_p5 = scmp.lt.s32.totalorder %s2927_s14, %s2338_s4 }
 0x1b7   : > { %682 = vrot.lane.b32.xlu0 %v2799_v11, %s2430_s26 }
 0x225   : > { %v512_v13 = vpop.permute.xlu0 %511  ;;  %v681_v15 = vpop.permute.xlu1 %680 }
 0x226   : > { %1933 = vmatpush3.xpose.msk.msra.mxu1 %vm513_vm2, %v512_v13 }
 0x227   : > { %1937 = vmatprep.subr.mxu1 %v2427_v1 }
 0x229   : > { %1935 = vmatmul.mubr.msk.f32.vlgmr.msra.gmra.mrb[0].mxu1 %vm513_vm2, %v2799_v11  ;;  %v683_v14 = vpop.permute.xlu0 %682 }
 0x22a   : > { %1943 = vmatpush3.xpose.msk.msra.mxu0 %vm513_vm2, %v683_v14  ;;  %1939 = vmatprep.mubr.msk.f32.mxu1 %vm2426_vm0, %v2427_v1 }
 0x22b   : > { %1952 = vmatprep.subr.mxu0 %v2427_v1 }
 0x22d   : > { %1945 = vmatmul.mubr.msk.f32.vlgmr.msra.gmra.mrb[2].mxu0 %vm513_vm2, %v681_v15 }
 0x22e   : > { %1954 = vmatprep.mubr.msk.f32.mxu0 %vm2426_vm0, %v2427_v1  ;;  %1953 = vmatpush3.msra.mxu0 %v507_v41 }
 0x22f   : > { %1962 = vmatprep.subr.mxu0 %v2427_v1 }
 0x2fc   : > { %v584_v20 = vpop.f32.mrb[0].mxu1 }
 0x2fd   : > { %v588_v22 = vmul.f32 0.35355338, %v584_v20  ;;  %v1936_v23 = vpop.f32.mrb[1].mxu1 }
 0x2ff   : > { %v592_v24 = vsel %vm2816_vm4, %v588_v22, -1e+09 }
 0x300   : > { %v754_v25 = vpop.f32.mrb[2].mxu0  ;;  %v593_v26 = vsel %vm513_vm2, %v592_v24, -inf }
 0x301   : > { %v758_v27 = vmul.f32 0.35355338, %v754_v25  ;;  %594 = vmax.xlane.f32.xlu1 %v593_v26  ;;  %v1946_v28 = vpop.f32.mrb[3].mxu0 }
 0x303   : > { %v759_v29 = vsel %vm2816_vm4, %v758_v27, -1e+09 }
 0x304   : > { %v760_v30 = vsel %vm513_vm2, %v759_v29, -inf }
 0x305   : > { %761 = vmax.xlane.f32.xlu0 %v760_v30 }
 0x38e   : > { %v595_v31 = vpop.xlane.xlu1 %594 }
 0x38f   : > { %v596_v32 = vsub.f32 %v592_v24, %v595_v31 }
 0x391   : > { %v597_v33 = vmul.f32 1.442695, %v596_v32 }
 0x392   : > { %v762_v34 = vpop.xlane.xlu0 %761 }
 0x393   : > { %2141 = vpow2.f32 %v597_v33  ;;  %v763_v35 = vsub.f32 %v759_v29, %v762_v34 }
 0x395   : > { %v764_v36 = vmul.f32 1.442695, %v763_v35 }
 0x397   : > { %2143 = vpow2.f32 %v764_v36 }
 0x39d   : > { %v2142_v37 = vpop.eup %2141 }
 0x39e   : > { %v599_v38 = vsel %vm513_vm2, %v2142_v37, 0.0 }
 0x39f   : > { %600 = vadd.xlane.f32.xlu0 %v599_v38 }
 0x3a1   : > { %v2144_v39 = vpop.eup %2143 }
 0x3a2   : > { %v766_v40 = vsel %vm513_vm2, %v2144_v39, 0.0 }
 0x3a3   : > { %767 = vadd.xlane.f32.xlu1 %v766_v40  ;;  %v1476_v40 = vlaneseq }
 0x3a5   : > { %v2889_v41 = vshrl.u32 %v1476_v40, 7 }
 0x3b4   : > { %771 = vrot.lane.b32.xlu1 %v2799_v11, %s2432_s2  ;;  %s2925_s2 = scalar_lea.hbm %s2978_s8, %s1879_s9 }
 0x3b5   : > { %604 = vrot.lane.b32.xlu0 %v2799_v11, %s2433_s22  ;;  %s1695_s22 = scalar_lea.sflag [#allocation4], %s2749_s5 }
 0x3b8   : > { %995 = vrot.lane.b32.xlu1 %v2799_v11, %s2434_s16  ;;  %s2333_s16 = scalar_lea.vmem %s2927_s14, 128 }
 0x3b9   : > { %993 = vrot.lane.b32.xlu0 %v2799_v11, %s2435_s20  ;;  %p2334_p0 = scmp.ne.s32.totalorder %s2927_s14, %s2333_s16  ;;  %s2339_s20 = scalar_lea.vmem %s2338_s4, 256 }
 0x3ba   : > { %p2341_p7 = scmp.lt.s32.totalorder %s2339_s20, %s2333_s16 }
 0x3bb   : > { %p2335_p4 = pnand %p2334_p0, %p3011_p2 }
 0x3bc   : > { %p2342_p8 = por %p2341_p7, %p2340_p5 }
 0x3bd   : > { %p2336_p10 = pneg %p2335_p4 }
 0x3bf   : > { %p2343_p6 = pnand %p2342_p8, %p2336_p10 }
 0x42c   : > { %v601_v42 = vpop.xlane.xlu0 %600 }
 0x42d   : > { %2145 = vrcp.f32 %v601_v42  ;;  %v1478_v42 = vsub.s32 0, %v2889_v41 }
 0x430   : > { %v768_v43 = vpop.xlane.xlu1 %767  ;;  %v605_v44 = vpop.permute.xlu0 %604 }
 0x431   : > { %2147 = vrcp.f32 %v768_v43  ;;  %1938 = vmatpush3.msra.mxu1 %v605_v44  ;;  %v2895_v43 = vld [vmem:[%s2977_s7] sm:$0xff] }
 0x432   : > { %1947 = vmatprep.subr.mxu1 %v2427_v1  ;;  %v1479_v44 = vrot.slane %v2895_v43, %v1478_v42 }
 0x434   : > { %v772_v47 = vpop.permute.xlu1 %771  ;;  %v994_v56 = vpop.permute.xlu0 %993 }
 0x437   : > { %v2146_v45 = vpop.eup %2145 }
 0x438   : > { %v603_v46 = vmul.f32 %v2146_v45, %v2142_v37  ;;  %v996_v54 = vpop.permute.xlu1 %995 }
 0x43a   : > { %1940 = vmatmul.mubr.msk.f32.vlgmr.msra.gmra.mrb[2].mxu1 %vm513_vm2, %v603_v46 }
 0x43b   : > { %v2148_v48 = vpop.eup %2147  ;;  %1948 = vmatpush3.msra.mxu1 %v772_v47  ;;  %1949 = vmatprep.mubr.msk.f32.mxu1 %vm2426_vm0, %v2427_v1 }
 0x43c   : > { %v770_v49 = vmul.f32 %v2148_v48, %v2144_v39  ;;  %1957 = vmatprep.subr.mxu1 %v2427_v1 }
 0x43e   : > { %1950 = vmatmul.mubr.msk.f32.vlgmr.msra.gmra.mrb[4].mxu1 %vm513_vm2, %v770_v49 }
 0x43f   : > { %1959 = vmatprep.mubr.msk.f32.mxu1 %vm2426_vm0, %v2427_v1  ;;  %1958 = vmatpush3.msra.mxu1 %v506_v50 }
 0x440   : > { %1967 = vmatprep.subr.mxu1 %v2427_v1 }
 0x50d   : > { %v676_v51 = vpop.f32.mrb[2].mxu1 }
 0x50e   : > { %v1941_v52 = vpop.f32.mrb[3].mxu1  ;;  %1960 = vmatmul.mubr.msk.f32.vlgmr.msra.gmra.mrb[6].mxu1 %vm513_vm2, %v676_v51 }
 0x50f   : > { %1969 = vmatprep.mubr.msk.f32.mxu1 %vm2426_vm0, %v2427_v1 }
 0x511   : > { %v843_v53 = vpop.f32.mrb[4].mxu1 }
 0x512   : > { %v1951_v55 = vpop.f32.mrb[5].mxu1  ;;  %1955 = vmatmul.mubr.msk.f32.vlgmr.msra.gmra.mrb[4].mxu0 %vm513_vm2, %v843_v53 }
 0x513   : > { %1963 = vmatpush3.xpose.msk.msra.mxu0 %vm513_vm2, %v996_v54  ;;  %1964 = vmatprep.mubr.msk.f32.mxu0 %vm2426_vm0, %v2427_v1  ;;  %v1506_v55 = vld [vmem:[#allocation10] sm:$0xff] }
 0x514   : > { %1972 = vmatprep.subr.mxu0 %v2427_v1 }
 0x516   : > { %1965 = vmatmul.mubr.msk.f32.vlgmr.msra.gmra.mrb[6].mxu0 %vm513_vm2, %v994_v56  ;;  %v1507_v56 = vld [vmem:[#allocation10 + $0x8] sm:$0xff] }
 0x517   : > { %1974 = vmatprep.mubr.msk.f32.mxu0 %vm2426_vm0, %v2427_v1  ;;  %1973 = vmatpush3.msra.mxu0 %v508_v18 }
 0x518   : > { %1982 = vmatprep.subr.mxu0 %v2427_v1 }
 0x5e1   : > { %v989_v57 = vpop.f32.mrb[6].mxu1 }
 0x5e2   : > { %v1961_v58 = vpop.f32.mrb[7].mxu1 }
 0x5e3   : > { %v1508_v58 = vld [vmem:[#allocation10 + $0x10] sm:$0xff] }
 0x5e5   : > { %v916_v59 = vpop.f32.mrb[4].mxu0 }
 0x5e6   : > { %v2853_v60 = vadd.f32 %v989_v57, %v916_v59  ;;  %v1956_v61 = vpop.f32.mrb[5].mxu0  ;;  %v2021_v57 = vpack.c.bf16 %v1507_v56, %v1506_v55  ;;  %v1509_v59 = vld [vmem:[#allocation10 + $0x18] sm:$0xff] }
 0x5e7   : > { %v1589_v61 = vld [vmem:[#allocation11 + $0x8] sm:$0xff] }
 0x5e9   : > { %v1067_v62 = vpop.f32.mrb[6].mxu0 }
 0x5ea   : > { %v1071_v63 = vmul.f32 0.35355338, %v1067_v62  ;;  %v1966_v2 = vpop.f32.mrb[7].mxu0 }
 0x5ec   : > { %v1072_v3 = vsel %vm2816_vm4, %v1071_v63, -1e+09 }
 0x5ed   : > { %v1073_v4 = vsel %vm513_vm2, %v1072_v3, -inf }
 0x5ee   : > { %1074 = vmax.xlane.f32.xlu1 %v1073_v4  ;;  %v1498_v4 = vsub.s32 3, %v2889_v41 }
 0x5ff   : > { %1236 = vrot.lane.b32.xlu1 %v2799_v11, %s2436_s10 }
 0x603   : > { %1234 = vrot.lane.b32.xlu1 %v2799_v11, %s2437_s15 }
 0x67b   : > { %v1075_v5 = vpop.xlane.xlu1 %1074 }
 0x67c   : > { %v1076_v6 = vsub.f32 %v1072_v3, %v1075_v5  ;;  %v1503_v5 = vsub.s32 4, %v2889_v41 }
 0x67e   : > { %v1077_v7 = vmul.f32 1.442695, %v1076_v6  ;;  %v1499_v6 = vrot.slane %v2895_v43, %v1498_v4 }
 0x67f   : > { %v1237_v15 = vpop.permute.xlu1 %1236 }
 0x680   : > { %2149 = vpow2.f32 %v1077_v7 }
 0x683   : > { %v1235_v17 = vpop.permute.xlu1 %1234 }
 0x68a   : > { %v2150_v9 = vpop.eup %2149 }
 0x68b   : > { %v1079_v10 = vsel %vm513_vm2, %v2150_v9, 0.0 }
 0x68c   : > { %1080 = vadd.xlane.f32.xlu0 %v1079_v10  ;;  %v1504_v10 = vrot.slane %v2895_v43, %v1503_v5 }
 0x6a2   : > { %1084 = vrot.lane.b32.xlu0 %v2799_v11, %s2438_s0 }
 0x719   : > { %v1081_v12 = vpop.xlane.xlu0 %1080 }
 0x71a   : > { %2151 = vrcp.f32 %v1081_v12 }
 0x71d   : > { %v1085_v13 = vpop.permute.xlu0 %1084 }
 0x71e   : > { %1968 = vmatpush3.msra.mxu1 %v1085_v13 }
 0x71f   : > { %1977 = vmatprep.subr.mxu1 %v2427_v1 }
 0x724   : > { %v2152_v14 = vpop.eup %2151 }
 0x725   : > { %v1083_v16 = vmul.f32 %v2152_v14, %v2150_v9  ;;  %v1590_v14 = vld [vmem:[#allocation11 + $0x10] sm:$0xff] }
 0x727   : > { %1970 = vmatmul.mubr.msk.f32.vlgmr.msra.gmra.mrb[8].mxu1 %vm513_vm2, %v1083_v16  ;;  %v1512_v16 = vsub.s32 1, %v2889_v41 }
 0x728   : > { %1978 = vmatpush3.xpose.msk.msra.mxu1 %vm513_vm2, %v1237_v15  ;;  %1979 = vmatprep.mubr.msk.f32.mxu1 %vm2426_vm0, %v2427_v1 }
 0x729   : > { %1987 = vmatprep.subr.mxu1 %v2427_v1 }
 0x72b   : > { %1980 = vmatmul.mubr.msk.f32.vlgmr.msra.gmra.mrb[10].mxu1 %vm513_vm2, %v1235_v17  ;;  %v1513_v17 = vrot.slane %v2895_v43, %v1512_v16 }
 0x72c   : > { %1989 = vmatprep.mubr.msk.f32.mxu1 %vm2426_vm0, %v2427_v1  ;;  %1988 = vmatpush3.msra.mxu1 %v509_v21 }
 0x72d   : > { %2026 = vmatprep.subr.bf16.mxu1 %v2425_v0 }
 0x7fa   : > { %v1156_v19 = vpop.f32.mrb[8].mxu1 }
 0x7fb   : > { %v1971_v20 = vpop.f32.mrb[9].mxu1  ;;  %1975 = vmatmul.mubr.msk.f32.vlgmr.msra.gmra.mrb[8].mxu0 %vm513_vm2, %v1156_v19 }
 0x7fc   : > { %1984 = vmatprep.mubr.msk.f32.mxu0 %vm2426_vm0, %v2427_v1 }
 0x7fe   : > { %v1308_v22 = vpop.f32.mrb[10].mxu1 }
 0x7ff   : > { %v1312_v23 = vmul.f32 0.35355338, %v1308_v22  ;;  %v1981_v24 = vpop.f32.mrb[11].mxu1 }
 0x801   : > { %v1313_v25 = vsel %vm2816_vm4, %v1312_v23, -1e+09  ;;  %v1594_v23 = vsub.s32 2, %v2889_v41 }
 0x802   : > { %v1314_v26 = vsel %vm513_vm2, %v1313_v25, -inf }
 0x803   : > { %1315 = vmax.xlane.f32.xlu0 %v1314_v26  ;;  %v1595_v24 = vrot.slane %v2895_v43, %v1594_v23 }
 0x819   : > { %1325 = vrot.lane.b32.xlu0 %v2799_v11, %s2439_s12 }
 0x890   : > { %v1316_v27 = vpop.xlane.xlu0 %1315 }
 0x891   : > { %v1317_v28 = vsub.f32 %v1313_v25, %v1316_v27 }
 0x893   : > { %v1318_v29 = vmul.f32 1.442695, %v1317_v28 }
 0x894   : > { %v1326_v30 = vpop.permute.xlu0 %1325 }
 0x895   : > { %2153 = vpow2.f32 %v1318_v29  ;;  %1983 = vmatpush3.msra.mxu0 %v1326_v30 }
 0x896   : > { %2020 = vmatprep.subr.bf16.mxu0 %v2425_v0 }
 0x89f   : > { %v2154_v31 = vpop.eup %2153 }
 0x8a0   : > { %v1320_v32 = vsel %vm513_vm2, %v2154_v31, 0.0 }
 0x8a1   : > { %1321 = vadd.xlane.f32.xlu1 %v1320_v32 }
 0x8ce   : > { %v1229_v33 = vpop.f32.mrb[8].mxu0 }
 0x8cf   : > { %v1233_v34 = vadd.f32 %v1229_v33, %v2853_v60  ;;  %v1976_v11 = vpop.f32.mrb[9].mxu0  ;;  %v2024_v60 = vpack.c.bf16 %v1509_v59, %v1508_v58 }
 0x92e   : > { %v1322_v35 = vpop.xlane.xlu1 %1321 }
 0x92f   : > { %2155 = vrcp.f32 %v1322_v35 }
 0x939   : > { %v2156_v36 = vpop.eup %2155 }
 0x93a   : > { %v1324_v37 = vmul.f32 %v2156_v36, %v2154_v31  ;;  %v1685_v36 = vsub.s32 5, %v2889_v41 }
 0x93c   : > { %1985 = vmatmul.mubr.msk.f32.vlgmr.msra.gmra.mrb[10].mxu0 %vm513_vm2, %v1324_v37  ;;  %v1690_v37 = vsub.s32 6, %v2889_v41 }
 0x93d   : > { %2000 = vmatprep.mubr.msk.f32.mxu0 %vm2426_vm0, %v2427_v1  ;;  %2022 = vmatpush3.bf16.msra.mxu0 %v2021_v57 }
 0x93e   : > { %2023 = vmatprep.subr.bf16.mxu0 %v2425_v0  ;;  %v1691_v42 = vrot.slane %v2895_v43, %v1690_v37 }
 0x941   : > { %2025 = vmatpush3.bf16.msra.mxu0 %v2024_v60 }
 0xa0f   : > { %v1397_v38 = vpop.f32.mrb[10].mxu0 }
 0xa10   : > { %v1986_v39 = vpop.f32.mrb[11].mxu0  ;;  %1990 = vmatmul.mubr.msk.f32.vlgmr.msra.gmra.mrb[12].mxu1 %vm513_vm2, %v1397_v38  ;;  %v1686_v38 = vrot.slane %v2895_v43, %v1685_v36 }
 0xa11   : > { %2011 = vmatprep.mubr.msk.f32.mxu1 %vm2426_vm0, %v2427_v1 }
 0xae3   : > { %v1470_v45 = vpop.f32.mrb[12].mxu1 }
 0xae4   : > { %v1474_v46 = vadd.f32 %v1470_v45, %v1233_v34  ;;  %v1991_v47 = vpop.f32.mrb[13].mxu1 }
 0xae6   : > { %v1480_v48 = vadd.f32 %v1479_v44, %v1474_v46 }
 0xae8   : > { %v1481_v49 = vadd.f32 %v1480_v48, %v2789_v8  ;;  %v1588_v8 = vld [vmem:[#allocation11] sm:$0xff] }
 0xae9   : > { %v2027_v62 = vpack.c.bf16 %v1589_v61, %v1588_v8 }
 0xaea   : > { %v1482_v1 = vsel %vm430_vm1, %v1481_v49, 0.0 }
 0xaeb   : > { %1483 = vadd.xlane.f32.xlu1 %v1482_v1  ;;  %2028 = vmatpush3.bf16.msra.mxu1 %v2027_v62 }
 0xaec   : > { %2029 = vmatprep.subr.bf16.mxu1 %v2425_v0  ;;  %v1591_v0 = vld [vmem:[#allocation11 + $0x18] sm:$0xff] }
 0xaed   : > { %v2030_v15 = vpack.c.bf16 %v1591_v0, %v1590_v14 }
 0xaef   : > { %2031 = vmatpush3.bf16.msra.mxu1 %v2030_v15 }
 0xb78   : > { %v1484_v50 = vpop.xlane.xlu1 %1483 }
 0xb79   : > { %v1486_v51 = vmul.f32 0.03125, %v1484_v50 }
 0xb7b   : > { %v1487_v52 = vsub.f32 %v1481_v49, %v1486_v51 }
 0xb7d   : > { %v1488_v53 = vmul.f32 %v1487_v52, %v1487_v52 }
 0xb7f   : > { %v1489_v54 = vsel %vm430_vm1, %v1488_v53, 0.0 }
 0xb80   : > { %1490 = vadd.xlane.f32.xlu1 %v1489_v54 }
 0xc0d   : > { %v1491_v63 = vpop.xlane.xlu1 %1490 }
 0xc0e   : > { %v1492_v2 = vmul.f32 0.03125, %v1491_v63 }
 0xc10   : > { %v1493_v3 = vadd.f32 1e-05, %v1492_v2 }
 0xc12   : > { %2157 = vrsqrt.f32 %v1493_v3 }
 0xc1c   : > { %v2158_v7 = vpop.eup %2157 }
 0xc1d   : > { %v1495_v9 = vmul.f32 %v2158_v7, %v1487_v52 }
 0xc1f   : > { %v1500_v12 = vmul.f32 %v1499_v6, %v1495_v9 }
 0xc21   : > { %v1505_v13 = vadd.f32 %v1504_v10, %v1500_v12 }
 0xc23   : > { %2001 = vmatmul.mubr.msk.f32.vlgmr.msra.gmra.mrb[12].mxu0 %vm430_vm1, %v1505_v13 }
 0xcf6   : > { %v1583_v18 = vpop.f32.mrb[12].mxu0 }
 0xcf7   : > { %v1584_v19 = vadd.f32 %v1583_v18, %v1513_v17  ;;  %v2002_v20 = vpop.f32.mrb[13].mxu0 }
 0xcf9   : > { %v1587_v22 = vmax.f32 %v1584_v19, 0.0 }
 0xcfb   : > { %2012 = vmatmul.mubr.msk.f32.vlgmr.msra.gmra.mrb[14].mxu1 %vm430_vm1, %v1587_v22 }
 0xdce   : > { %v1665_v25 = vpop.f32.mrb[14].mxu1 }
 0xdcf   : > { %v1666_v26 = vadd.f32 %v1665_v25, %v1595_v24  ;;  %v2013_v27 = vpop.f32.mrb[15].mxu1 }
 0xdd1   : > { %v1669_v28 = vadd.f32 %v1666_v26, %v1505_v13 }
 0xdd3   : > { %v1670_v29 = vsel %vm430_vm1, %v1669_v28, 0.0 }
 0xdd4   : > { %1671 = vadd.xlane.f32.xlu1 %v1670_v29 }
 0xe61   : > { %v1672_v30 = vpop.xlane.xlu1 %1671 }
 0xe62   : > { %v1673_v31 = vmul.f32 0.03125, %v1672_v30 }
 0xe64   : > { %v1674_v32 = vsub.f32 %v1669_v28, %v1673_v31 }
 0xe66   : > { %v1675_v21 = vmul.f32 %v1674_v32, %v1674_v32 }
 0xe68   : > { %v1676_v33 = vsel %vm430_vm1, %v1675_v21, 0.0 }
 0xe69   : > { %1677 = vadd.xlane.f32.xlu1 %v1676_v33 }
 0xef6   : > { %v1678_v34 = vpop.xlane.xlu1 %1677 }
 0xef7   : > { %v1679_v11 = vmul.f32 0.03125, %v1678_v34 }
 0xef9   : > { %v1680_v35 = vadd.f32 1e-05, %v1679_v11 }
 0xefb   : > { %2159 = vrsqrt.f32 %v1680_v35 }
 0xf05   : > { %v2160_v39 = vpop.eup %2159 }
 0xf06   : > { %v1682_v40 = vmul.f32 %v2160_v39, %v1674_v32 }
 0xf08   : > { %v1687_v44 = vmul.f32 %v1686_v38, %v1682_v40 }
 0xf0a   : > { %v1692_v45 = vadd.f32 %v1691_v42, %v1687_v44 }
 0xf0c   : > { %1693 = vst.msk [vmem:[%s415_s17] sm:$0xff] %vm430_vm1, %v1692_v45 }
 0xf0d   : > { %2346 = shalt.err (!%p2343_p6)
}
 0xf0e   : > { %s2347_s5 = scalar_lea.hbm %s2925_s2, 128  ;;  %s2351_s0 = scalar_lea.hbm %s2978_s8, 256 }
 0xf0f   : > { %p2348_p11 = scmp.ne.s32.totalorder %s2925_s2, %s2347_s5  ;;  %p2352_p12 = scmp.lt.u32.totalorder %s2925_s2, %s2978_s8 }
 0xf10   : > { %p2353_p3 = scmp.lt.u32.totalorder %s2351_s0, %s2347_s5  ;;  %p2355_p0 = scmp.lt.u32.totalorder %s2347_s5, %s2925_s2 }
 0xf11   : > { %p2349_p1 = pnand %p2348_p11, %p3011_p2 }
 0xf12   : > { %p2354_p13 = por %p2353_p3, %p2352_p12 }
 0xf13   : > { %p2350_p9 = pneg %p2349_p1 }
 0xf14   : > { %p2356_p4 = por %p2355_p0, %p2354_p13 }
 0xf16   : > { %p2357_p10 = pnand %p2356_p4, %p2350_p9 }
 0xf18   : > { %2360 = shalt.err (!%p2357_p10)
}
 0xf19   : > { %2052 = dma.vmem_to_hbm [thread:$0]  (%p3011_p2), %s2927_s14, 128, %s2925_s2, %s1695_s22  }
 0xf1a PF: > { %s1720_s25 = sand.u32 1, %s2403_s27   ;;  %p3012_p5 = scmp.ne.s32.totalorder %s2997_s24, 0 }
 0xf1b   : > { %p3013_p7 = scmp.ge.s32.totalorder %s2415_s30, 2  ;;  %s1721_s9 = scalar_lea.sflag [#allocation4], %s1720_s25 }
 0xf1d   : > { %p2075_p8 = pnand %p3013_p7, %p3012_p5 }
 0xf1f   : > { %2398 = dma.done.wait (!%p2075_p8), %s1721_s9, 128  }
 0xf20   : > { %2400 = vsyncadd (!%p2075_p8), %s1721_s9, 4294967168  ;;  %p26_p6 = scmp.ge.s32.totalorder %s2638_s23, 4   ;;  %s3014_s27 = smov %s2407_s28 }
 0xf21   : > { %s3015_s28 = smov %s2411_s29  ;;  %s3016_s29 = smov %s2649_s21 }
 0xf22   : > { %s3017_s30 = smov %s2638_s23  ;;  %28 = sbr.rel (!%p26_p6) target bundleno = 14 (0xe), region = 126 }
 0xf29   :  { %1726 = vsyncpa [#allocation3], 1 }
 0xf2a   :  { %1728 = vsyncpa [#allocation3 + $0x1], 1 }
 0xf2b   :  { %1729 = vsyncpa [#allocation6], 1 }
 0xf2c   :  { %1731 = vsyncpa [#allocation6 + $0x1], 1 }
 0xf2d   :  { %1732 = vsyncpa [#allocation9], 1 }
 0xf2e   :  { %1733 = vsyncpa [#allocation12], 1 }
 0xf2f   :  { %1734 = vsyncpa [#allocation4], 1 }
 0xf30   :  { %1736 = vsyncpa [#allocation4 + $0x1], 1 }

</bundles_post_ra>
